<compile_context>
chip_gen: v6e
topology: v6e:2x2x1
jax: 0.10.0
libtpu: 0.0.40
codegen_flags: <defaults>
</compile_context>

<pallas_src>
import jax
import jax.numpy as jnp
from jax.experimental import pallas as pl
from jax.experimental.pallas import tpu as pltpu

LANE = 128        # TPU lane width; all padded layer widths
TB_ALIGN = 256    # batch-tile alignment (full v6e/v7x 256-row MXU passes)
H1 = 128          # layer1 output width (already lane-aligned)
H2 = 64           # layer2 real output width (padded to LANE in the kernel)


def _round_up(n, m):
    return (n + m - 1) // m * m


def dqn_kernel(x_ref, w1_ref, b1_ref, w2_ref, b2_ref, w3_ref, b3_ref, o_ref):
    # Fully unrolled 3-dot body. Matmul operands are bf16 (MXU-native),
    # accumulation + bias + ReLU are f32 on the VPU. All operands are
    # lane-dense (128-wide) except x's K=16, which is harmless.
    x = x_ref[...].astype(jnp.bfloat16)                              # (TB, F)
    h1 = jnp.dot(x, w1_ref[...], preferred_element_type=jnp.float32)
    h1 = jnp.maximum(h1 + b1_ref[...], 0.0)                          # (TB, 128) f32
    h2 = jnp.dot(h1.astype(jnp.bfloat16), w2_ref[...],
                 preferred_element_type=jnp.float32)
    h2 = jnp.maximum(h2 + b2_ref[...], 0.0)                          # (TB, 128) f32, cols 64: == 0
    out = jnp.dot(h2.astype(jnp.bfloat16), w3_ref[...],
                  preferred_element_type=jnp.float32)
    o_ref[...] = (out + b3_ref[...]).astype(o_ref.dtype)             # (TB, 128) bf16 store


def pad_params(params):
    """Zero-pad narrow dims to 128 lanes and cast weights to bf16.

    ReLU(0) = 0 and zero weight rows/cols contribute nothing, so the real
    output columns match the unpadded computation (up to bf16 matmul rounding).
    Biases stay f32 and padded bias entries stay exactly zero.
    """
    w1, b1, w2, b2, w3, b3 = params
    actions = w3.shape[1]
    w1b = w1.astype(jnp.bfloat16)
    w2p = jnp.zeros((H1, LANE), jnp.bfloat16).at[:, :H2].set(w2.astype(jnp.bfloat16))
    b2p = jnp.zeros((1, LANE), jnp.float32).at[:, :H2].set(b2)
    w3p = jnp.zeros((LANE, LANE), jnp.bfloat16).at[:H2, :actions].set(w3.astype(jnp.bfloat16))
    b3p = jnp.zeros((1, LANE), jnp.float32).at[:, :actions].set(b3)
    return (w1b, b1, w2p, b2p, w3p, b3p)


def dqn_forward(x, padded_params, actions, *, tb=4096):
    """x: (B, in_features) f32. Returns (B, actions) f32 Q-values."""
    w1, b1, w2p, b2p, w3p, b3p = padded_params
    B, F = x.shape

    # Batch tile: multiple of 256, capped at `tb`, and sized so the grid has
    # >= 2 steps whenever the 256-aligned batch allows it (keeps both v7x
    # TensorCores busy under dimension_semantics=("parallel",)).
    tb = max(TB_ALIGN, _round_up(tb, TB_ALIGN))
    B_ceil = _round_up(B, TB_ALIGN)
    TB = min(tb, max(TB_ALIGN, _round_up(B_ceil // 2, TB_ALIGN)))
    B_pad = _round_up(B, TB)
    if B_pad != B:
        x = jnp.pad(x, ((0, B_pad - B), (0, 0)))   # zero rows -> bias-only junk, sliced off
    grid = (B_pad // TB,)

    # Advisory cost so XLA schedules/overlaps this short call sensibly.
    flops = 2 * B_pad * (F * H1 + H1 * LANE + LANE * LANE)
    bytes_accessed = (
        4 * B_pad * F + 2 * B_pad * LANE                     # x in (f32), out (bf16)
        + 2 * (F * H1 + H1 * LANE + LANE * LANE)             # bf16 weights
        + 4 * (H1 + LANE + LANE)                             # f32 biases
    )
    cost = pl.CostEstimate(flops=flops, transcendentals=0,
                           bytes_accessed=bytes_accessed)

    out_padded = pl.pallas_call(
        dqn_kernel,
        out_shape=jax.ShapeDtypeStruct((B_pad, LANE), jnp.bfloat16),
        grid=grid,
        in_specs=[
            pl.BlockSpec((TB, F), lambda i: (i, 0)),        # x: tiled over batch
            pl.BlockSpec((F, H1), lambda i: (0, 0)),        # w1 (bf16): resident
            pl.BlockSpec((1, H1), lambda i: (0, 0)),        # b1 (f32): resident
            pl.BlockSpec((H1, LANE), lambda i: (0, 0)),     # w2 padded (bf16): resident
            pl.BlockSpec((1, LANE), lambda i: (0, 0)),      # b2 padded (f32): resident
            pl.BlockSpec((LANE, LANE), lambda i: (0, 0)),   # w3 padded (bf16): resident
            pl.BlockSpec((1, LANE), lambda i: (0, 0)),      # b3 padded (f32): resident
        ],
        out_specs=pl.BlockSpec((TB, LANE), lambda i: (i, 0)),
        compiler_params=pltpu.CompilerParams(
            # Batch tiles are independent -> shard grid across v7x's 2 TCs.
            dimension_semantics=("parallel",),
            # Sized for v7x's 64 MiB VMEM; TB=4096 tiles use ~5 MiB total.
            vmem_limit_bytes=32 * 1024 * 1024,
        ),
        cost_estimate=cost,
    )(x, w1, b1, w2p, b2p, w3p, b3p)

    # Drop batch padding / padded action columns; cast back to f32 for callers.
    # (Consumers doing argmax over Q-values could instead read out_padded
    # directly and skip this extra slice pass.)
    return out_padded[:B, :actions].astype(jnp.float32)


def init_params(key, in_features, actions):
    # Deterministic synthetic init (uniform, roughly torch's fan_in scaling).
    # Weights stored transposed vs. torch.nn.Linear: W has shape (in, out) so
    # y = x @ W + b matches torch's y = x @ W_t.T + b_t.
    ks = jax.random.split(key, 6)

    def lin(kw, kb, fan_in, fan_out):
        bound = 1.0 / jnp.sqrt(jnp.float32(fan_in))
        w = jax.random.uniform(kw, (fan_in, fan_out), jnp.float32, -bound, bound)
        b = jax.random.uniform(kb, (1, fan_out), jnp.float32, -bound, bound)
        return w, b

    w1, b1 = lin(ks[0], ks[1], in_features, H1)
    w2, b2 = lin(ks[2], ks[3], H1, H2)
    w3, b3 = lin(ks[4], ks[5], H2, actions)
    return (w1, b1, w2, b2, w3, b3)


def dqn_reference(x, params):
    w1, b1, w2, b2, w3, b3 = params
    h1 = jnp.maximum(x @ w1 + b1, 0.0)
    h2 = jnp.maximum(h1 @ w2 + b2, 0.0)
    return h2 @ w3 + b3


if __name__ == "__main__":
    nr, nc, actions = 4, 4, 4          # in_features = nr * nc = 16
    batch = 2
    key = jax.random.PRNGKey(0)
    kx, kp = jax.random.split(key)
    x = jax.random.normal(kx, (batch, nr * nc), jnp.float32)

    params = init_params(kp, nr * nc, actions)
    padded = pad_params(params)

    out = dqn_forward(x, padded, actions)
    out = jax.block_until_ready(out)

    ref = dqn_reference(x, params)
    assert out.shape == (batch, actions)
    # bf16 MXU operands + bf16 output store -> not bit-identical to f32 ref.
    assert jnp.allclose(out, ref, atol=5e-2, rtol=5e-2)
    print("KERNEL_OK")
</pallas_src>

<mosaic_0001>
module attributes {stable_mosaic.version = 11 : i64} {
  func.func @dqn_kernel(%arg0: i32, %arg1: memref<256x16xf32, #tpu.memory_space<vmem>>, %arg2: memref<16x128xbf16, #tpu.memory_space<vmem>>, %arg3: memref<1x128xf32, #tpu.memory_space<vmem>>, %arg4: memref<128x128xbf16, #tpu.memory_space<vmem>>, %arg5: memref<1x128xf32, #tpu.memory_space<vmem>>, %arg6: memref<128x128xbf16, #tpu.memory_space<vmem>>, %arg7: memref<1x128xf32, #tpu.memory_space<vmem>>, %arg8: memref<256x128xbf16, #tpu.memory_space<vmem>>) attributes {dimension_semantics = [#tpu.dimension_semantics<parallel>], iteration_bounds = array<i64: 1>, scalar_prefetch = 0 : i64, scratch_operands = 0 : i64, tpu.core_type = #tpu.core_type<tc>, window_params = [{transform_indices = @transform_0, window_bounds = array<i64: 256, 16>}, {pipeline_mode = #tpu.pipeline_mode<synchronous>, transform_indices = @transform_1, window_bounds = array<i64: 16, 128>}, {pipeline_mode = #tpu.pipeline_mode<synchronous>, transform_indices = @transform_2, window_bounds = array<i64: 1, 128>}, {pipeline_mode = #tpu.pipeline_mode<synchronous>, transform_indices = @transform_3, window_bounds = array<i64: 128, 128>}, {pipeline_mode = #tpu.pipeline_mode<synchronous>, transform_indices = @transform_4, window_bounds = array<i64: 1, 128>}, {pipeline_mode = #tpu.pipeline_mode<synchronous>, transform_indices = @transform_5, window_bounds = array<i64: 128, 128>}, {pipeline_mode = #tpu.pipeline_mode<synchronous>, transform_indices = @transform_6, window_bounds = array<i64: 1, 128>}, {transform_indices = @transform_7, window_bounds = array<i64: 256, 128>}]} {
    %c0 = arith.constant 0 : index
    %c0_0 = arith.constant 0 : index
    %0 = vector.load %arg1[%c0, %c0_0] : memref<256x16xf32, #tpu.memory_space<vmem>>, vector<256x16xf32>
    %1 = arith.truncf %0 : vector<256x16xf32> to vector<256x16xbf16>
    %c0_1 = arith.constant 0 : index
    %c0_2 = arith.constant 0 : index
    %2 = vector.load %arg2[%c0_1, %c0_2] : memref<16x128xbf16, #tpu.memory_space<vmem>>, vector<16x128xbf16>
    %cst = arith.constant dense<0.000000e+00> : vector<256x128xf32>
    %3 = tpu.matmul %1, %2, %cst {dimension_numbers = #tpu.dot_dimension_numbers<[1], [0], [0], [1], [0, 0, 1, 1], [], []>} : vector<256x16xbf16>, vector<16x128xbf16>, vector<256x128xf32> -> vector<256x128xf32>
    %c0_3 = arith.constant 0 : index
    %c0_4 = arith.constant 0 : index
    %4 = vector.load %arg3[%c0_3, %c0_4] : memref<1x128xf32, #tpu.memory_space<vmem>>, vector<1x128xf32>
    %5 = vector.broadcast %4 : vector<1x128xf32> to vector<256x128xf32>
    %6 = arith.addf %3, %5 : vector<256x128xf32>
    %cst_5 = arith.constant 0.000000e+00 : f32
    %7 = vector.broadcast %cst_5 : f32 to vector<256x128xf32>
    %8 = arith.maximumf %6, %7 : vector<256x128xf32>
    %9 = arith.truncf %8 : vector<256x128xf32> to vector<256x128xbf16>
    %c0_6 = arith.constant 0 : index
    %c0_7 = arith.constant 0 : index
    %10 = vector.load %arg4[%c0_6, %c0_7] : memref<128x128xbf16, #tpu.memory_space<vmem>>, vector<128x128xbf16>
    %cst_8 = arith.constant dense<0.000000e+00> : vector<256x128xf32>
    %11 = tpu.matmul %9, %10, %cst_8 {dimension_numbers = #tpu.dot_dimension_numbers<[1], [0], [0], [1], [0, 0, 1, 1], [], []>} : vector<256x128xbf16>, vector<128x128xbf16>, vector<256x128xf32> -> vector<256x128xf32>
    %c0_9 = arith.constant 0 : index
    %c0_10 = arith.constant 0 : index
    %12 = vector.load %arg5[%c0_9, %c0_10] : memref<1x128xf32, #tpu.memory_space<vmem>>, vector<1x128xf32>
    %13 = vector.broadcast %12 : vector<1x128xf32> to vector<256x128xf32>
    %14 = arith.addf %11, %13 : vector<256x128xf32>
    %cst_11 = arith.constant 0.000000e+00 : f32
    %15 = vector.broadcast %cst_11 : f32 to vector<256x128xf32>
    %16 = arith.maximumf %14, %15 : vector<256x128xf32>
    %17 = arith.truncf %16 : vector<256x128xf32> to vector<256x128xbf16>
    %c0_12 = arith.constant 0 : index
    %c0_13 = arith.constant 0 : index
    %18 = vector.load %arg6[%c0_12, %c0_13] : memref<128x128xbf16, #tpu.memory_space<vmem>>, vector<128x128xbf16>
    %cst_14 = arith.constant dense<0.000000e+00> : vector<256x128xf32>
    %19 = tpu.matmul %17, %18, %cst_14 {dimension_numbers = #tpu.dot_dimension_numbers<[1], [0], [0], [1], [0, 0, 1, 1], [], []>} : vector<256x128xbf16>, vector<128x128xbf16>, vector<256x128xf32> -> vector<256x128xf32>
    %c0_15 = arith.constant 0 : index
    %c0_16 = arith.constant 0 : index
    %20 = vector.load %arg7[%c0_15, %c0_16] : memref<1x128xf32, #tpu.memory_space<vmem>>, vector<1x128xf32>
    %21 = vector.broadcast %20 : vector<1x128xf32> to vector<256x128xf32>
    %22 = arith.addf %19, %21 : vector<256x128xf32>
    %23 = arith.truncf %22 : vector<256x128xf32> to vector<256x128xbf16>
    %c0_17 = arith.constant 0 : index
    %c0_18 = arith.constant 0 : index
    %24 = vector.load %arg8[%c0_17, %c0_18] : memref<256x128xbf16, #tpu.memory_space<vmem>>, vector<256x128xbf16>
    tpu.vector_store %arg8[%c0_17, %c0_18], %23 {strides = array<i32>} : memref<256x128xbf16, #tpu.memory_space<vmem>>, vector<256x128xbf16>,
    return
  }
  func.func @transform_0(%arg0: i32) -> (i32, i32) {
    %c0_i32 = arith.constant 0 : i32
    %c0_i32_0 = arith.constant 0 : i32
    return %arg0, %c0_i32 : i32, i32
  }
  func.func @transform_1(%arg0: i32) -> (i32, i32) {
    %c0_i32 = arith.constant 0 : i32
    %c0_i32_0 = arith.constant 0 : i32
    %c0_i32_1 = arith.constant 0 : i32
    return %c0_i32, %c0_i32_0 : i32, i32
  }
  func.func @transform_2(%arg0: i32) -> (i32, i32) {
    %c0_i32 = arith.constant 0 : i32
    %c0_i32_0 = arith.constant 0 : i32
    %c0_i32_1 = arith.constant 0 : i32
    return %c0_i32, %c0_i32_0 : i32, i32
  }
  func.func @transform_3(%arg0: i32) -> (i32, i32) {
    %c0_i32 = arith.constant 0 : i32
    %c0_i32_0 = arith.constant 0 : i32
    %c0_i32_1 = arith.constant 0 : i32
    return %c0_i32, %c0_i32_0 : i32, i32
  }
  func.func @transform_4(%arg0: i32) -> (i32, i32) {
    %c0_i32 = arith.constant 0 : i32
    %c0_i32_0 = arith.constant 0 : i32
    %c0_i32_1 = arith.constant 0 : i32
    return %c0_i32, %c0_i32_0 : i32, i32
  }
  func.func @transform_5(%arg0: i32) -> (i32, i32) {
    %c0_i32 = arith.constant 0 : i32
    %c0_i32_0 = arith.constant 0 : i32
    %c0_i32_1 = arith.constant 0 : i32
    return %c0_i32, %c0_i32_0 : i32, i32
  }
  func.func @transform_6(%arg0: i32) -> (i32, i32) {
    %c0_i32 = arith.constant 0 : i32
    %c0_i32_0 = arith.constant 0 : i32
    %c0_i32_1 = arith.constant 0 : i32
    return %c0_i32, %c0_i32_0 : i32, i32
  }
  func.func @transform_7(%arg0: i32) -> (i32, i32) {
    %c0_i32 = arith.constant 0 : i32
    %c0_i32_0 = arith.constant 0 : i32
    return %arg0, %c0_i32 : i32, i32
  }
}

</mosaic_0001>

<bundles_post_ra>
// kernel: tpu_custom_call.1
= control target key start
LH: loop header
LB: loop body
LE: loop exit
PB: predicated region body
PF: predicated region fallthrough
CT: control target
= control target key end

     0   :  { %vm91_vm0 = vcmask 130048   ;;  %s1806_s0 = inlined_call_operand.vmem [shape: f32[256,16], index: 0, kind: input, shape index: {}]   ;;  %s1807_s1 = inlined_call_operand.vmem [shape: bf16[16,128], index: 1, kind: input, shape index: {}]   ;;  %s1808_s2 = inlined_call_operand.vmem [shape: f32[1,128], index: 2, kind: input, shape index: {}]   ;;  %s1809_s3 = inlined_call_operand.vmem [shape: bf16[128,128], index: 3, kind: input, shape index: {}]   ;;  %s1810_s4 = inlined_call_operand.vmem [shape: f32[1,128], index: 4, kind: input, shape index: {}]   ;;  %s1811_s5 = inlined_call_operand.vmem [shape: bf16[128,128], index: 5, kind: input, shape index: {}]   ;;  %s1812_s6 = inlined_call_operand.vmem [shape: f32[1,128], index: 6, kind: input, shape index: {}]   ;;  %s1813_s7 = inlined_call_operand.hbm [shape: bf16[256,128], index: 7, kind: output, shape index: {}]  }
   0x1   :  { %v1432_v0 = vld [vmem:[%s1807_s1] sm:$0xff]   ;;  %v29_v2 = vld [vmem:[%s1806_s0 + $0x8] sm:$0xff]  ;;  %v30_v3 = vld [vmem:[%s1806_s0 + $0x10] sm:$0xff] }
   0x2   :  { %v28_v1 = vld [vmem:[%s1806_s0] sm:$0xff]  ;;  %1297 = vmatprep.subr.bf16.mxu0 %v1432_v0  ;;  %v31_v5 = vld [vmem:[%s1806_s0 + $0x18] sm:$0xff]  ;;  %v33_v7 = vld [vmem:[%s1806_s0 + $0x28] sm:$0xff]  ;;  %1427 = vmatprep.subr.bf16.mxu1 %v1432_v0 }
   0x3   :  { %v60_v4 = vpack.c.bf16 %v29_v2, %v28_v1  ;;  %v32_v6 = vld [vmem:[%s1806_s0 + $0x20] sm:$0xff]  ;;  %1298 = vmatpush3.bf16.msra.mxu0 %v1432_v0  ;;  %v61_v8 = vpack.c.bf16 %v31_v5, %v30_v3  ;;  %1428 = vmatpush3.bf16.msra.mxu1 %v1432_v0  ;;  %v34_v10 = vld [vmem:[%s1806_s0 + $0x30] sm:$0xff]  ;;  %v35_v11 = vld [vmem:[%s1806_s0 + $0x38] sm:$0xff] }
   0x4   :  { %v62_v9 = vpack.c.bf16 %v33_v7, %v32_v6  ;;  %v44_v12 = vld [vmem:[%s1806_s0 + $0x80] sm:$0xff]  ;;  %v45_v13 = vld [vmem:[%s1806_s0 + $0x88] sm:$0xff]  ;;  %v46_v15 = vld [vmem:[%s1806_s0 + $0x90] sm:$0xff]  ;;  %v63_v23 = vpack.c.bf16 %v35_v11, %v34_v10 }
   0x5   :  { %1299 = vmatprep.mubr.msk.bf16.mxu0 %vm91_vm0, %v60_v4  ;;  %v68_v14 = vpack.c.bf16 %v45_v13, %v44_v12  ;;  %v47_v16 = vld [vmem:[%s1806_s0 + $0x98] sm:$0xff]  ;;  %v48_v17 = vld [vmem:[%s1806_s0 + $0xa0] sm:$0xff]  ;;  %v37_v19 = vld [vmem:[%s1806_s0 + $0x48] sm:$0xff] }
   0x6   :  { %1300 = vmatmul.mubr.msk.bf16.vlgmr.msra.gmra.mxu0 %vm91_vm0, %v61_v8  ;;  %v36_v18 = vld [vmem:[%s1806_s0 + $0x40] sm:$0xff]  ;;  %v69_v20 = vpack.c.bf16 %v47_v16, %v46_v15  ;;  %v49_v21 = vld [vmem:[%s1806_s0 + $0xa8] sm:$0xff]  ;;  %v50_v24 = vld [vmem:[%s1806_s0 + $0xb0] sm:$0xff] }
   0x7   :  { %1303 = vmatprep.mubr.msk.bf16.mxu0 %vm91_vm0, %v62_v9  ;;  %1315 = vmatprep.mubr.msk.bf16.mxu1 %vm91_vm0, %v68_v14  ;;  %v70_v22 = vpack.c.bf16 %v49_v21, %v48_v17  ;;  %v51_v25 = vld [vmem:[%s1806_s0 + $0xb8] sm:$0xff]  ;;  %v64_v26 = vpack.c.bf16 %v37_v19, %v36_v18  ;;  %v52_v27 = vld [vmem:[%s1806_s0 + $0xc0] sm:$0xff]  ;;  %v53_v28 = vld [vmem:[%s1806_s0 + $0xc8] sm:$0xff] }
   0x8   :  { %1316 = vmatmul.mubr.msk.bf16.vlgmr.msra.gmra.mxu1 %vm91_vm0, %v69_v20  ;;  %v1433_v29 = vld [vmem:[%s1809_s3 + $0x38] sm:$0xff]   ;;  %v38_v30 = vld [vmem:[%s1806_s0 + $0x50] sm:$0xff]  ;;  %v40_v33 = vld [vmem:[%s1806_s0 + $0x60] sm:$0xff]  ;;  %v71_v34 = vpack.c.bf16 %v51_v25, %v50_v24  ;;  %v72_v36 = vpack.c.bf16 %v53_v28, %v52_v27 }
   0x9   :  { %1319 = vmatprep.mubr.msk.bf16.mxu1 %vm91_vm0, %v70_v22  ;;  %v39_v31 = vld [vmem:[%s1806_s0 + $0x58] sm:$0xff]  ;;  %v1434_v32 = vld [vmem:[%s1809_s3 + $0x30] sm:$0xff]   ;;  %1331 = vmatprep.subr.bf16.mxu1 %v1433_v29  ;;  %v41_v35 = vld [vmem:[%s1806_s0 + $0x68] sm:$0xff] }
   0xa   :  { %1332 = vmatpush3.bf16.msra.mxu1 %v1433_v29  ;;  %v1435_v37 = vld [vmem:[%s1809_s3 + $0x28] sm:$0xff]   ;;  %v54_v38 = vld [vmem:[%s1806_s0 + $0xd0] sm:$0xff]  ;;  %v55_v39 = vld [vmem:[%s1806_s0 + $0xd8] sm:$0xff]  ;;  %v65_v40 = vpack.c.bf16 %v39_v31, %v38_v30  ;;  %v66_v44 = vpack.c.bf16 %v41_v35, %v40_v33 }
   0xb   :  { %1333 = vmatprep.subr.bf16.mxu1 %v1434_v32  ;;  %v56_v41 = vld [vmem:[%s1806_s0 + $0xe0] sm:$0xff]  ;;  %v57_v42 = vld [vmem:[%s1806_s0 + $0xe8] sm:$0xff]  ;;  %v42_v45 = vld [vmem:[%s1806_s0 + $0x70] sm:$0xff]  ;;  %v73_v47 = vpack.c.bf16 %v55_v39, %v54_v38 }
   0xc   :  { %v1436_v43 = vld [vmem:[%s1809_s3 + $0x20] sm:$0xff]   ;;  %v43_v46 = vld [vmem:[%s1806_s0 + $0x78] sm:$0xff]  ;;  %v74_v48 = vpack.c.bf16 %v57_v42, %v56_v41 }
   0xd   :  { %v1437_v49 = vld [vmem:[%s1809_s3 + $0x18] sm:$0xff]  }
   0xe   :  { %1304 = vmatmul.mubr.msk.bf16.gmra.mxu0 %vm91_vm0, %v63_v23  ;;  %1334 = vmatpush3.bf16.msra.mxu1 %v1434_v32 }
   0xf   :  { %1307 = vmatprep.mubr.msk.bf16.mxu0 %vm91_vm0, %v64_v26  ;;  %1335 = vmatprep.subr.bf16.mxu1 %v1435_v37 }
  0x10   :  { %1320 = vmatmul.mubr.msk.bf16.gmra.mxu1 %vm91_vm0, %v71_v34 }
  0x11   :  { %1323 = vmatprep.mubr.msk.bf16.mxu1 %vm91_vm0, %v72_v36 }
  0x12   :  { %1336 = vmatpush3.bf16.msra.mxu1 %v1435_v37 }
  0x13   :  { %1337 = vmatprep.subr.bf16.mxu1 %v1436_v43 }
  0x16   :  { %1308 = vmatmul.mubr.msk.bf16.gmra.mxu0 %vm91_vm0, %v65_v40 }
  0x17   :  { %1311 = vmatprep.mubr.msk.bf16.mxu0 %vm91_vm0, %v66_v44 }
  0x18   :  { %12 = vsyncpa [#allocation3], 0  ;;  %v67_v50 = vpack.c.bf16 %v43_v46, %v42_v45  ;;  %1324 = vmatmul.mubr.msk.bf16.gmra.mxu1 %vm91_vm0, %v73_v47  ;;  %v58_v51 = vld [vmem:[%s1806_s0 + $0xf0] sm:$0xff]  ;;  %v59_v52 = vld [vmem:[%s1806_s0 + $0xf8] sm:$0xff] }
  0x19   :  { %1327 = vmatprep.mubr.msk.bf16.mxu1 %vm91_vm0, %v74_v48  ;;  %1338 = vmatpush3.bf16.msra.mxu1 %v1436_v43  ;;  %v75_v53 = vpack.c.bf16 %v59_v52, %v58_v51  ;;  %v1438_v54 = vld [vmem:[%s1809_s3 + $0x10] sm:$0xff]   ;;  %v1439_v55 = vld [vmem:[%s1809_s3 + $0x8] sm:$0xff]   ;;  %v1440_v56 = vld [vmem:[%s1809_s3] sm:$0xff]  }
  0x1a   :  { %1339 = vmatprep.subr.bf16.mxu1 %v1437_v49  ;;  %v1441_v57 = vld [vmem:[%s1811_s5 + $0x38] sm:$0xff]   ;;  %v1442_v58 = vld [vmem:[%s1811_s5 + $0x30] sm:$0xff]   ;;  %v1443_v59 = vld [vmem:[%s1811_s5 + $0x28] sm:$0xff]  }
  0x1b   :  { %1379 = vmatprep.subr.bf16.mxu0 %v1441_v57  ;;  %v1444_v60 = vld [vmem:[%s1811_s5 + $0x20] sm:$0xff]   ;;  %v1445_v61 = vld [vmem:[%s1811_s5 + $0x18] sm:$0xff]  }
  0x1c   :  { %1380 = vmatpush3.bf16.msra.mxu0 %v1441_v57  ;;  %v1671_v0 = vld [vmem:[%s1808_s2] ss:$0 sm:$0xff] }
  0x1d   :  { %1340 = vmatpush3.bf16.msra.mxu1 %v1437_v49  ;;  %1381 = vmatprep.subr.bf16.mxu0 %v1442_v58 }
  0x1e   :  { %1312 = vmatmul.mubr.msk.bf16.gmra.mxu0 %vm91_vm0, %v67_v50  ;;  %1341 = vmatprep.subr.bf16.mxu1 %v1438_v54 }
  0x20   :  { %1328 = vmatmul.mubr.msk.bf16.gmra.mxu1 %vm91_vm0, %v75_v53  ;;  %1382 = vmatpush3.bf16.msra.mxu0 %v1442_v58 }
  0x21   :  { %1342 = vmatpush3.bf16.msra.mxu1 %v1438_v54  ;;  %1383 = vmatprep.subr.bf16.mxu0 %v1443_v59 }
  0x22   :  { %1343 = vmatprep.subr.bf16.mxu1 %v1439_v55 }
  0x24   :  { %1384 = vmatpush3.bf16.msra.mxu0 %v1443_v59 }
  0x25   :  { %1344 = vmatpush3.bf16.msra.mxu1 %v1439_v55  ;;  %1385 = vmatprep.subr.bf16.mxu0 %v1444_v60 }
  0x26   :  { %1345 = vmatprep.subr.bf16.mxu1 %v1440_v56 }
  0x28   :  { %1386 = vmatpush3.bf16.msra.mxu0 %v1444_v60 }
  0x29   :  { %1346 = vmatpush3.bf16.msra.mxu1 %v1440_v56  ;;  %1387 = vmatprep.subr.bf16.mxu0 %v1445_v61 }
  0x2c   :  { %1388 = vmatpush3.bf16.msra.mxu0 %v1445_v61 }
  0xc6   :  { %v1301_v62 = vpop.f32.mrf.mxu0 }
  0xc7   :  { %v183_v5 = vadd.f32 %v1301_v62, %v1671_v0 }
  0xc8   :  { %v174_v63 = vpop.f32.mrf.mxu0  ;;  %v1673_v2 = vpop.f32.mrf.mxu1 }
  0xc9   :  { %v175_v3 = vadd.f32 %v1671_v0, %v174_v63  ;;  %v303_v14 = vmax.f32 %v183_v5, 0.0 }
  0xca   :  { %v1302_v1 = vpop.f32.mrf.mxu0  ;;  %v238_v7 = vpop.f32.mrf.mxu1 }
  0xcb   :  { %v186_v4 = vadd.f32 %v1302_v1, %v1671_v0  ;;  %v301_v12 = vmax.f32 %v175_v3, 0.0  ;;  %v239_v52 = vadd.f32 %v1671_v0, %v238_v7 }
  0xcc   :  { %v177_v6 = vpop.f32.mrf.mxu0  ;;  %v1679_v11 = vpop.f32.mrf.mxu1 }
  0xcd   :  { %v178_v8 = vadd.f32 %v1671_v0, %v177_v6  ;;  %v304_v9 = vmax.f32 %v186_v4, 0.0  ;;  %v317_v61 = vmax.f32 %v239_v52, 0.0  ;;  %v1732_v52 = vld [vmem:[%s1810_s4] ss:$0 sm:$0xff] }
  0xce   :  { %v1305_v10 = vpop.f32.mrf.mxu0  ;;  %v241_v16 = vpop.f32.mrf.mxu1 }
  0xcf   :  { %v302_v13 = vmax.f32 %v178_v8, 0.0  ;;  %v334_v18 = vpack.c.bf16 %v304_v9, %v303_v14  ;;  %v199_v23 = vadd.f32 %v1305_v10, %v1671_v0  ;;  %v242_v53 = vadd.f32 %v1671_v0, %v241_v16 }
  0xd0   :  { %v190_v15 = vpop.f32.mrf.mxu0  ;;  %v1681_v20 = vpop.f32.mrf.mxu1  ;;  %v250_v14 = vadd.f32 %v1679_v11, %v1671_v0 }
  0xd1   :  { %v333_v17 = vpack.c.bf16 %v302_v13, %v301_v12  ;;  %v191_v21 = vadd.f32 %v1671_v0, %v190_v15  ;;  %v307_v32 = vmax.f32 %v199_v23, 0.0  ;;  %v318_v63 = vmax.f32 %v242_v53, 0.0 }
  0xd2   :  { %v1306_v19 = vpop.f32.mrf.mxu0  ;;  %v254_v25 = vpop.f32.mrf.mxu1  ;;  %v247_v12 = vadd.f32 %v1673_v2, %v1671_v0  ;;  %v263_v2 = vadd.f32 %v1681_v20, %v1671_v0 }
  0xd3   :  { %v202_v22 = vadd.f32 %v1306_v19, %v1671_v0  ;;  %1347 = vmatprep.mubr.bf16.mxu1 %v333_v17  ;;  %v305_v30 = vmax.f32 %v191_v21, 0.0  ;;  %v341_v8 = vpack.c.bf16 %v318_v63, %v317_v61  ;;  %v255_v9 = vadd.f32 %v1671_v0, %v254_v25 }
  0xd4   :  { %v193_v24 = vpop.f32.mrf.mxu0  ;;  %1348 = vmatmul.mubr.bf16.vlgmr.msra.gmra.mxu1 %v334_v18  ;;  %v1687_v29 = vpop.f32.mrf.mxu1  ;;  %v319_v18 = vmax.f32 %v247_v12, 0.0  ;;  %v320_v19 = vmax.f32 %v250_v14, 0.0 }
  0xd5   :  { %v194_v26 = vadd.f32 %v1671_v0, %v193_v24  ;;  %v308_v27 = vmax.f32 %v202_v22, 0.0  ;;  %v321_v16 = vmax.f32 %v255_v9, 0.0  ;;  %v266_v11 = vadd.f32 %v1687_v29, %v1671_v0 }
  0xd6   :  { %v1309_v28 = vpop.f32.mrf.mxu0  ;;  %v257_v34 = vpop.f32.mrf.mxu1  ;;  %v342_v25 = vpack.c.bf16 %v320_v19, %v319_v18 }
  0xd7   :  { %v306_v31 = vmax.f32 %v194_v26, 0.0  ;;  %v336_v36 = vpack.c.bf16 %v308_v27, %v307_v32  ;;  %v215_v41 = vadd.f32 %v1309_v28, %v1671_v0  ;;  %v258_v10 = vadd.f32 %v1671_v0, %v257_v34 }
  0xd8   :  { %v206_v33 = vpop.f32.mrf.mxu0  ;;  %v1689_v38 = vpop.f32.mrf.mxu1 }
  0xd9   :  { %v335_v35 = vpack.c.bf16 %v306_v31, %v305_v30  ;;  %v207_v39 = vadd.f32 %v1671_v0, %v206_v33  ;;  %v311_v49 = vmax.f32 %v215_v41, 0.0  ;;  %v322_v17 = vmax.f32 %v258_v10, 0.0 }
  0xda   :  { %v1310_v37 = vpop.f32.mrf.mxu0  ;;  %v270_v46 = vpop.f32.mrf.mxu1  ;;  %v323_v30 = vmax.f32 %v263_v2, 0.0  ;;  %v324_v31 = vmax.f32 %v266_v11, 0.0  ;;  %v279_v20 = vadd.f32 %v1689_v38, %v1671_v0  ;;  %v1446_v38 = vld [vmem:[%s1811_s5 + $0x10] sm:$0xff]  }
  0xdb   :  { %v218_v40 = vadd.f32 %v1310_v37, %v1671_v0  ;;  %1351 = vmatprep.mubr.bf16.mxu1 %v335_v35  ;;  %v309_v47 = vmax.f32 %v207_v39, 0.0  ;;  %v343_v22 = vpack.c.bf16 %v322_v17, %v321_v16  ;;  %v271_v23 = vadd.f32 %v1671_v0, %v270_v46  ;;  %1389 = vmatprep.subr.bf16.mxu0 %v1446_v38 }
  0xdc   :  { %v209_v42 = vpop.f32.mrf.mxu0  ;;  %1352 = vmatmul.mubr.bf16.gmra.mxu1 %v336_v36  ;;  %v1326_v56 = vpop.f32.mrf.mxu1  ;;  %v344_v36 = vpack.c.bf16 %v324_v31, %v323_v30  ;;  %1390 = vmatpush3.bf16.msra.mxu0 %v1446_v38 }
  0xdd   :  { %v210_v43 = vadd.f32 %v1671_v0, %v209_v42  ;;  %v312_v44 = vmax.f32 %v218_v40, 0.0  ;;  %v325_v27 = vmax.f32 %v271_v23, 0.0  ;;  %v282_v37 = vadd.f32 %v1326_v56, %v1671_v0 }
  0xde   :  { %v1313_v45 = vpop.f32.mrf.mxu0  ;;  %v273_v3 = vpop.f32.mrf.mxu1  ;;  %v327_v40 = vmax.f32 %v279_v20, 0.0 }
  0xdf   :  { %v310_v48 = vmax.f32 %v210_v43, 0.0  ;;  %v338_v54 = vpack.c.bf16 %v312_v44, %v311_v49  ;;  %v231_v59 = vadd.f32 %v1313_v45, %v1671_v0  ;;  %v274_v24 = vadd.f32 %v1671_v0, %v273_v3  ;;  %v1447_v49 = vld [vmem:[%s1811_s5 + $0x8] sm:$0xff]  }
  0xe0   :  { %v222_v50 = vpop.f32.mrf.mxu0  ;;  %v1329_v15 = vpop.f32.mrf.mxu1  ;;  %v328_v41 = vmax.f32 %v282_v37, 0.0  ;;  %1391 = vmatprep.subr.bf16.mxu0 %v1447_v49 }
  0xe1   :  { %v337_v51 = vpack.c.bf16 %v310_v48, %v309_v47  ;;  %v223_v57 = vadd.f32 %v1671_v0, %v222_v50  ;;  %v315_v6 = vmax.f32 %v231_v59, 0.0  ;;  %v326_v28 = vmax.f32 %v274_v24, 0.0  ;;  %1392 = vmatpush3.bf16.msra.mxu0 %v1447_v49 }
  0xe2   :  { %v1314_v55 = vpop.f32.mrf.mxu0  ;;  %v286_v21 = vpop.f32.mrf.mxu1  ;;  %v346_v43 = vpack.c.bf16 %v328_v41, %v327_v40  ;;  %v295_v44 = vadd.f32 %v1329_v15, %v1671_v0 }
  0xe3   :  { %v234_v58 = vadd.f32 %v1314_v55, %v1671_v0  ;;  %1355 = vmatprep.mubr.bf16.mxu1 %v337_v51  ;;  %v313_v4 = vmax.f32 %v223_v57, 0.0  ;;  %v345_v33 = vpack.c.bf16 %v326_v28, %v325_v27  ;;  %v287_v34 = vadd.f32 %v1671_v0, %v286_v21 }
  0xe4   :  { %v225_v60 = vpop.f32.mrf.mxu0  ;;  %1356 = vmatmul.mubr.bf16.gmra.mxu1 %v338_v54  ;;  %v1330_v26 = vpop.f32.mrf.mxu1  ;;  %v331_v46 = vmax.f32 %v295_v44, 0.0 }
  0xe5   :  { %v226_v62 = vadd.f32 %v1671_v0, %v225_v60  ;;  %v316_v1 = vmax.f32 %v234_v58, 0.0  ;;  %v329_v29 = vmax.f32 %v287_v34, 0.0  ;;  %v298_v45 = vadd.f32 %v1330_v26, %v1671_v0 }
  0xe6   :  { %v289_v32 = vpop.f32.mrf.mxu1 }
  0xe7   :  { %v314_v5 = vmax.f32 %v226_v62, 0.0  ;;  %v340_v13 = vpack.c.bf16 %v316_v1, %v315_v6  ;;  %v290_v35 = vadd.f32 %v1671_v0, %v289_v32  ;;  %v332_v47 = vmax.f32 %v298_v45, 0.0  ;;  %v1448_v0 = vld [vmem:[%s1811_s5] sm:$0xff]  }
  0xe8   :  { %1393 = vmatprep.subr.bf16.mxu0 %v1448_v0 }
  0xe9   :  { %v339_v7 = vpack.c.bf16 %v314_v5, %v313_v4  ;;  %v330_v39 = vmax.f32 %v290_v35, 0.0  ;;  %v348_v48 = vpack.c.bf16 %v332_v47, %v331_v46  ;;  %1394 = vmatpush3.bf16.msra.mxu0 %v1448_v0 }
  0xeb   :  { %1359 = vmatprep.mubr.bf16.mxu1 %v339_v7  ;;  %v347_v42 = vpack.c.bf16 %v330_v39, %v329_v29 }
  0xec   :  { %1360 = vmatmul.mubr.bf16.gmra.mxu1 %v340_v13 }
  0xed   :  { %1363 = vmatprep.mubr.bf16.mxu1 %v341_v8 }
  0xf4   :  { %1364 = vmatmul.mubr.bf16.gmra.mxu1 %v342_v25 }
  0xf5   :  { %1367 = vmatprep.mubr.bf16.mxu1 %v343_v22 }
  0xfc   :  { %1368 = vmatmul.mubr.bf16.gmra.mxu1 %v344_v36 }
  0xfd   :  { %1371 = vmatprep.mubr.bf16.mxu1 %v345_v33 }
 0x104   :  { %1372 = vmatmul.mubr.bf16.gmra.mxu1 %v346_v43 }
 0x105   :  { %1375 = vmatprep.mubr.bf16.mxu1 %v347_v42 }
 0x10c   :  { %1376 = vmatmul.mubr.bf16.gmra.mxu1 %v348_v48 }
 0x194   :  { %v1349_v50 = vpop.f32.mrf.mxu1 }
 0x195   :  { %v463_v56 = vadd.f32 %v1349_v50, %v1732_v52 }
 0x196   :  { %v454_v51 = vpop.f32.mrf.mxu1 }
 0x197   :  { %v455_v54 = vadd.f32 %v1732_v52, %v454_v51  ;;  %v583_v63 = vmax.f32 %v463_v56, 0.0 }
 0x198   :  { %v1350_v53 = vpop.f32.mrf.mxu1 }
 0x199   :  { %v466_v55 = vadd.f32 %v1350_v53, %v1732_v52  ;;  %v581_v61 = vmax.f32 %v455_v54, 0.0 }
 0x19a   :  { %v457_v57 = vpop.f32.mrf.mxu1 }
 0x19b   :  { %v458_v58 = vadd.f32 %v1732_v52, %v457_v57  ;;  %v584_v59 = vmax.f32 %v466_v55, 0.0 }
 0x19c   :  { %v1353_v60 = vpop.f32.mrf.mxu1 }
 0x19d   :  { %v582_v62 = vmax.f32 %v458_v58, 0.0  ;;  %v614_v4 = vpack.c.bf16 %v584_v59, %v583_v63  ;;  %v479_v8 = vadd.f32 %v1353_v60, %v1732_v52 }
 0x19e   :  { %v470_v1 = vpop.f32.mrf.mxu1 }
 0x19f   :  { %v613_v3 = vpack.c.bf16 %v582_v62, %v581_v61  ;;  %v471_v6 = vadd.f32 %v1732_v52, %v470_v1  ;;  %v587_v16 = vmax.f32 %v479_v8, 0.0 }
 0x1a0   :  { %v1354_v5 = vpop.f32.mrf.mxu1 }
 0x1a1   :  { %v482_v7 = vadd.f32 %v1354_v5, %v1732_v52  ;;  %1395 = vmatprep.mubr.bf16.mxu0 %v613_v3  ;;  %v585_v14 = vmax.f32 %v471_v6, 0.0 }
 0x1a2   :  { %v473_v9 = vpop.f32.mrf.mxu1  ;;  %1396 = vmatmul.mubr.bf16.vlgmr.msra.gmra.mxu0 %v614_v4 }
 0x1a3   :  { %v474_v10 = vadd.f32 %v1732_v52, %v473_v9  ;;  %v588_v12 = vmax.f32 %v482_v7, 0.0 }
 0x1a4   :  { %v1357_v13 = vpop.f32.mrf.mxu1 }
 0x1a5   :  { %v586_v15 = vmax.f32 %v474_v10, 0.0  ;;  %v616_v19 = vpack.c.bf16 %v588_v12, %v587_v16  ;;  %v495_v24 = vadd.f32 %v1357_v13, %v1732_v52 }
 0x1a6   :  { %v486_v17 = vpop.f32.mrf.mxu1 }
 0x1a7   :  { %v615_v18 = vpack.c.bf16 %v586_v15, %v585_v14  ;;  %v487_v22 = vadd.f32 %v1732_v52, %v486_v17  ;;  %v591_v30 = vmax.f32 %v495_v24, 0.0 }
 0x1a8   :  { %v1358_v21 = vpop.f32.mrf.mxu1 }
 0x1a9   :  { %v498_v23 = vadd.f32 %v1358_v21, %v1732_v52  ;;  %1399 = vmatprep.mubr.bf16.mxu0 %v615_v18  ;;  %v589_v27 = vmax.f32 %v487_v22, 0.0 }
 0x1aa   :  { %v489_v25 = vpop.f32.mrf.mxu1  ;;  %1400 = vmatmul.mubr.bf16.gmra.mxu0 %v616_v19 }
 0x1ab   :  { %v490_v2 = vadd.f32 %v1732_v52, %v489_v25  ;;  %v592_v11 = vmax.f32 %v498_v23, 0.0 }
 0x1ac   :  { %v1361_v26 = vpop.f32.mrf.mxu1 }
 0x1ad   :  { %v590_v28 = vmax.f32 %v490_v2, 0.0  ;;  %v618_v33 = vpack.c.bf16 %v592_v11, %v591_v30  ;;  %v511_v20 = vadd.f32 %v1361_v26, %v1732_v52 }
 0x1ae   :  { %v502_v31 = vpop.f32.mrf.mxu1 }
 0x1af   :  { %v617_v32 = vpack.c.bf16 %v590_v28, %v589_v27  ;;  %v503_v35 = vadd.f32 %v1732_v52, %v502_v31  ;;  %v595_v43 = vmax.f32 %v511_v20, 0.0 }
 0x1b0   :  { %v1362_v34 = vpop.f32.mrf.mxu1 }
 0x1b1   :  { %v514_v36 = vadd.f32 %v1362_v34, %v1732_v52  ;;  %1403 = vmatprep.mubr.bf16.mxu0 %v617_v32  ;;  %v593_v41 = vmax.f32 %v503_v35, 0.0 }
 0x1b2   :  { %v505_v37 = vpop.f32.mrf.mxu1  ;;  %1404 = vmatmul.mubr.bf16.gmra.mxu0 %v618_v33 }
 0x1b3   :  { %v506_v29 = vadd.f32 %v1732_v52, %v505_v37  ;;  %v596_v39 = vmax.f32 %v514_v36, 0.0 }
 0x1b4   :  { %v1365_v40 = vpop.f32.mrf.mxu1 }
 0x1b5   :  { %v594_v42 = vmax.f32 %v506_v29, 0.0  ;;  %v620_v46 = vpack.c.bf16 %v596_v39, %v595_v43  ;;  %v527_v49 = vadd.f32 %v1365_v40, %v1732_v52  ;;  %v1769_v39 = vld [vmem:[%s1812_s6] ss:$0 sm:$0xff]  ;;  %s1471_s6 = smov [#allocation2]  }
 0x1b6   :  { %v518_v44 = vpop.f32.mrf.mxu1  ;;  %s1026_s27 = sshll.u32 %s1471_s6, 4  ;;  %s1027_s27 = int_to_ptr.vmem [resolvable:$true] %s1026_s27 }
 0x1b7   :  { %v619_v45 = vpack.c.bf16 %v594_v42, %v593_v41  ;;  %v519_v48 = vadd.f32 %v1732_v52, %v518_v44  ;;  %v599_v56 = vmax.f32 %v527_v49, 0.0  ;;  %s1449_s28 = scalar_lea.vmem %s1027_s27, 2048  ;;  %p1454_p1 = scmp.lt.s32.totalorder %s1027_s27, %s1027_s27 }
 0x1b8   :  { %v1366_v47 = vpop.f32.mrf.mxu1  ;;  %p1450_p0 = scmp.ne.s32.totalorder %s1027_s27, %s1449_s28  ;;  %p1455_p2 = scmp.lt.s32.totalorder %s1449_s28, %s1449_s28 }
 0x1b9   :  { %v530_v38 = vadd.f32 %v1366_v47, %v1732_v52  ;;  %1407 = vmatprep.mubr.bf16.mxu0 %v619_v45  ;;  %v597_v54 = vmax.f32 %v519_v48, 0.0 }
 0x1ba   :  { %v521_v0 = vpop.f32.mrf.mxu1  ;;  %1408 = vmatmul.mubr.bf16.gmra.mxu0 %v620_v46  ;;  %p1456_p3 = por %p1455_p2, %p1454_p1 }
 0x1bb   :  { %v522_v50 = vadd.f32 %v1732_v52, %v521_v0  ;;  %v600_v51 = vmax.f32 %v530_v38, 0.0 }
 0x1bc   :  { %v1369_v53 = vpop.f32.mrf.mxu1  ;;  %p1457_p4 = pnand %p1456_p3, %p1450_p0 }
 0x1bd   :  { %v598_v55 = vmax.f32 %v522_v50, 0.0  ;;  %v622_v59 = vpack.c.bf16 %v600_v51, %v599_v56  ;;  %v543_v63 = vadd.f32 %v1369_v53, %v1732_v52 }
 0x1be   :  { %v534_v57 = vpop.f32.mrf.mxu1 }
 0x1bf   :  { %v621_v58 = vpack.c.bf16 %v598_v55, %v597_v54  ;;  %v535_v61 = vadd.f32 %v1732_v52, %v534_v57  ;;  %v603_v8 = vmax.f32 %v543_v63, 0.0 }
 0x1c0   :  { %v1370_v60 = vpop.f32.mrf.mxu1 }
 0x1c1   :  { %v546_v62 = vadd.f32 %v1370_v60, %v1732_v52  ;;  %1411 = vmatprep.mubr.bf16.mxu0 %v621_v58  ;;  %v601_v6 = vmax.f32 %v535_v61, 0.0 }
 0x1c2   :  { %v537_v1 = vpop.f32.mrf.mxu1  ;;  %1412 = vmatmul.mubr.bf16.gmra.mxu0 %v622_v59 }
 0x1c3   :  { %v538_v3 = vadd.f32 %v1732_v52, %v537_v1  ;;  %v604_v4 = vmax.f32 %v546_v62, 0.0 }
 0x1c4   :  { %v1373_v5 = vpop.f32.mrf.mxu1 }
 0x1c5   :  { %v602_v7 = vmax.f32 %v538_v3, 0.0  ;;  %v624_v12 = vpack.c.bf16 %v604_v4, %v603_v8  ;;  %v559_v16 = vadd.f32 %v1373_v5, %v1732_v52 }
 0x1c6   :  { %v550_v9 = vpop.f32.mrf.mxu1 }
 0x1c7   :  { %v623_v10 = vpack.c.bf16 %v602_v7, %v601_v6  ;;  %v551_v14 = vadd.f32 %v1732_v52, %v550_v9  ;;  %v607_v24 = vmax.f32 %v559_v16, 0.0 }
 0x1c8   :  { %v1374_v13 = vpop.f32.mrf.mxu1 }
 0x1c9   :  { %v562_v15 = vadd.f32 %v1374_v13, %v1732_v52  ;;  %1415 = vmatprep.mubr.bf16.mxu0 %v623_v10  ;;  %v605_v22 = vmax.f32 %v551_v14, 0.0 }
 0x1ca   :  { %v553_v17 = vpop.f32.mrf.mxu1  ;;  %1416 = vmatmul.mubr.bf16.gmra.mxu0 %v624_v12 }
 0x1cb   :  { %v554_v18 = vadd.f32 %v1732_v52, %v553_v17  ;;  %v608_v19 = vmax.f32 %v562_v15, 0.0 }
 0x1cc   :  { %v1377_v21 = vpop.f32.mrf.mxu1 }
 0x1cd   :  { %v606_v23 = vmax.f32 %v554_v18, 0.0  ;;  %v626_v11 = vpack.c.bf16 %v608_v19, %v607_v24  ;;  %v575_v30 = vadd.f32 %v1377_v21, %v1732_v52 }
 0x1ce   :  { %v566_v25 = vpop.f32.mrf.mxu1 }
 0x1cf   :  { %v625_v2 = vpack.c.bf16 %v606_v23, %v605_v22  ;;  %v567_v27 = vadd.f32 %v1732_v52, %v566_v25  ;;  %v611_v36 = vmax.f32 %v575_v30, 0.0 }
 0x1d0   :  { %v1378_v26 = vpop.f32.mrf.mxu1 }
 0x1d1   :  { %v578_v28 = vadd.f32 %v1378_v26, %v1732_v52  ;;  %1419 = vmatprep.mubr.bf16.mxu0 %v625_v2  ;;  %v609_v34 = vmax.f32 %v567_v27, 0.0 }
 0x1d2   :  { %v569_v31 = vpop.f32.mrf.mxu1  ;;  %1420 = vmatmul.mubr.bf16.gmra.mxu0 %v626_v11 }
 0x1d3   :  { %v570_v32 = vadd.f32 %v1732_v52, %v569_v31  ;;  %v612_v33 = vmax.f32 %v578_v28, 0.0 }
 0x1d5   :  { %v610_v35 = vmax.f32 %v570_v32, 0.0  ;;  %v628_v37 = vpack.c.bf16 %v612_v33, %v611_v36 }
 0x1d7   :  { %v627_v20 = vpack.c.bf16 %v610_v35, %v609_v34 }
 0x1d9   :  { %1423 = vmatprep.mubr.bf16.mxu0 %v627_v20 }
 0x1da   :  { %1424 = vmatmul.mubr.bf16.gmra.mxu0 %v628_v37 }
 0x262   :  { %v1397_v29 = vpop.f32.mrf.mxu0 }
 0x263   :  { %v743_v42 = vadd.f32 %v1397_v29, %v1769_v39 }
 0x264   :  { %v734_v40 = vpop.f32.mrf.mxu0 }
 0x265   :  { %v735_v44 = vadd.f32 %v1769_v39, %v734_v40 }
 0x266   :  { %v1398_v41 = vpop.f32.mrf.mxu0 }
 0x267   :  { %v746_v52 = vadd.f32 %v1398_v41, %v1769_v39 }
 0x268   :  { %v737_v43 = vpop.f32.mrf.mxu0 }
 0x269   :  { %v1145_v45 = vpack.c.bf16 %v746_v52, %v743_v42  ;;  %v738_v46 = vadd.f32 %v1769_v39, %v737_v43 }
 0x26a   :  { %v1401_v47 = vpop.f32.mrf.mxu0 }
 0x26b   :  { %1217 = vst [vmem:[#allocation2 + $0x8] sm:$0xff] %v1145_v45   ;;  %v1140_v48 = vpack.c.bf16 %v738_v46, %v735_v44  ;;  %v759_v0 = vadd.f32 %v1401_v47, %v1769_v39 }
 0x26c   :  { %v750_v38 = vpop.f32.mrf.mxu0 }
 0x26d   :  { %1141 = vst [vmem:[#allocation2] sm:$0xff] %v1140_v48   ;;  %v751_v53 = vadd.f32 %v1769_v39, %v750_v38 }
 0x26e   :  { %v1402_v49 = vpop.f32.mrf.mxu0 }
 0x26f   :  { %v762_v50 = vadd.f32 %v1402_v49, %v1769_v39 }
 0x270   :  { %v753_v51 = vpop.f32.mrf.mxu0 }
 0x271   :  { %v1155_v54 = vpack.c.bf16 %v762_v50, %v759_v0  ;;  %v754_v55 = vadd.f32 %v1769_v39, %v753_v51 }
 0x272   :  { %v1405_v56 = vpop.f32.mrf.mxu0 }
 0x273   :  { %1219 = vst [vmem:[#allocation2 + $0x18] sm:$0xff] %v1155_v54   ;;  %v1150_v57 = vpack.c.bf16 %v754_v55, %v751_v53  ;;  %v775_v60 = vadd.f32 %v1405_v56, %v1769_v39 }
 0x274   :  { %v766_v58 = vpop.f32.mrf.mxu0 }
 0x275   :  { %1218 = vst [vmem:[#allocation2 + $0x10] sm:$0xff] %v1150_v57   ;;  %v767_v63 = vadd.f32 %v1769_v39, %v766_v58 }
 0x276   :  { %v1406_v59 = vpop.f32.mrf.mxu0 }
 0x277   :  { %v778_v61 = vadd.f32 %v1406_v59, %v1769_v39 }
 0x278   :  { %v769_v62 = vpop.f32.mrf.mxu0 }
 0x279   :  { %v1165_v1 = vpack.c.bf16 %v778_v61, %v775_v60  ;;  %v770_v3 = vadd.f32 %v1769_v39, %v769_v62 }
 0x27a   :  { %v1409_v4 = vpop.f32.mrf.mxu0 }
 0x27b   :  { %1221 = vst [vmem:[#allocation2 + $0x28] sm:$0xff] %v1165_v1   ;;  %v1160_v5 = vpack.c.bf16 %v770_v3, %v767_v63  ;;  %v791_v8 = vadd.f32 %v1409_v4, %v1769_v39 }
 0x27c   :  { %v782_v6 = vpop.f32.mrf.mxu0 }
 0x27d   :  { %1220 = vst [vmem:[#allocation2 + $0x20] sm:$0xff] %v1160_v5   ;;  %v783_v12 = vadd.f32 %v1769_v39, %v782_v6 }
 0x27e   :  { %v1410_v7 = vpop.f32.mrf.mxu0 }
 0x27f   :  { %v794_v9 = vadd.f32 %v1410_v7, %v1769_v39 }
 0x280   :  { %v785_v10 = vpop.f32.mrf.mxu0 }
 0x281   :  { %v1175_v13 = vpack.c.bf16 %v794_v9, %v791_v8  ;;  %v786_v14 = vadd.f32 %v1769_v39, %v785_v10 }
 0x282   :  { %v1413_v15 = vpop.f32.mrf.mxu0 }
 0x283   :  { %1223 = vst [vmem:[#allocation2 + $0x38] sm:$0xff] %v1175_v13   ;;  %v1170_v16 = vpack.c.bf16 %v786_v14, %v783_v12  ;;  %v807_v19 = vadd.f32 %v1413_v15, %v1769_v39 }
 0x284   :  { %v798_v17 = vpop.f32.mrf.mxu0 }
 0x285   :  { %1222 = vst [vmem:[#allocation2 + $0x30] sm:$0xff] %v1170_v16   ;;  %v799_v23 = vadd.f32 %v1769_v39, %v798_v17 }
 0x286   :  { %v1414_v18 = vpop.f32.mrf.mxu0 }
 0x287   :  { %v810_v21 = vadd.f32 %v1414_v18, %v1769_v39 }
 0x288   :  { %v801_v22 = vpop.f32.mrf.mxu0 }
 0x289   :  { %v1185_v24 = vpack.c.bf16 %v810_v21, %v807_v19  ;;  %v802_v25 = vadd.f32 %v1769_v39, %v801_v22 }
 0x28a   :  { %v1417_v2 = vpop.f32.mrf.mxu0 }
 0x28b   :  { %1225 = vst [vmem:[#allocation2 + $0x48] sm:$0xff] %v1185_v24   ;;  %v1180_v11 = vpack.c.bf16 %v802_v25, %v799_v23  ;;  %v823_v28 = vadd.f32 %v1417_v2, %v1769_v39 }
 0x28c   :  { %v814_v26 = vpop.f32.mrf.mxu0 }
 0x28d   :  { %1224 = vst [vmem:[#allocation2 + $0x40] sm:$0xff] %v1180_v11   ;;  %v815_v32 = vadd.f32 %v1769_v39, %v814_v26 }
 0x28e   :  { %v1418_v27 = vpop.f32.mrf.mxu0 }
 0x28f   :  { %v826_v30 = vadd.f32 %v1418_v27, %v1769_v39 }
 0x290   :  { %v817_v31 = vpop.f32.mrf.mxu0 }
 0x291   :  { %v1195_v33 = vpack.c.bf16 %v826_v30, %v823_v28  ;;  %v818_v34 = vadd.f32 %v1769_v39, %v817_v31 }
 0x292   :  { %v1421_v35 = vpop.f32.mrf.mxu0 }
 0x293   :  { %1227 = vst [vmem:[#allocation2 + $0x58] sm:$0xff] %v1195_v33   ;;  %v1190_v36 = vpack.c.bf16 %v818_v34, %v815_v32  ;;  %v839_v29 = vadd.f32 %v1421_v35, %v1769_v39 }
 0x294   :  { %v830_v20 = vpop.f32.mrf.mxu0 }
 0x295   :  { %1226 = vst [vmem:[#allocation2 + $0x50] sm:$0xff] %v1190_v36   ;;  %v831_v42 = vadd.f32 %v1769_v39, %v830_v20 }
 0x296   :  { %v1422_v37 = vpop.f32.mrf.mxu0 }
 0x297   :  { %v842_v40 = vadd.f32 %v1422_v37, %v1769_v39 }
 0x298   :  { %v833_v41 = vpop.f32.mrf.mxu0 }
 0x299   :  { %v1205_v52 = vpack.c.bf16 %v842_v40, %v839_v29  ;;  %v834_v43 = vadd.f32 %v1769_v39, %v833_v41 }
 0x29a   :  { %v1425_v44 = vpop.f32.mrf.mxu0 }
 0x29b   :  { %1229 = vst [vmem:[#allocation2 + $0x68] sm:$0xff] %v1205_v52   ;;  %v1200_v45 = vpack.c.bf16 %v834_v43, %v831_v42  ;;  %v855_v48 = vadd.f32 %v1425_v44, %v1769_v39 }
 0x29c   :  { %v846_v46 = vpop.f32.mrf.mxu0 }
 0x29d   :  { %1228 = vst [vmem:[#allocation2 + $0x60] sm:$0xff] %v1200_v45   ;;  %v847_v0 = vadd.f32 %v1769_v39, %v846_v46 }
 0x29e   :  { %v1426_v47 = vpop.f32.mrf.mxu0 }
 0x29f   :  { %v858_v38 = vadd.f32 %v1426_v47, %v1769_v39 }
 0x2a0   :  { %v849_v49 = vpop.f32.mrf.mxu0 }
 0x2a1   :  { %v1215_v50 = vpack.c.bf16 %v858_v38, %v855_v48  ;;  %v850_v51 = vadd.f32 %v1769_v39, %v849_v49 }
 0x2a3   :  { %1231 = vst [vmem:[#allocation2 + $0x78] sm:$0xff] %v1215_v50   ;;  %v1210_v53 = vpack.c.bf16 %v850_v51, %v847_v0 }
 0x2a5   :  { %1230 = vst [vmem:[#allocation2 + $0x70] sm:$0xff] %v1210_v53  }
 0x2a6   :  { %1460 = shalt.err (!%p1457_p4)
}
 0x2a7   :  { %s1472_s29 = smov 64   ;;  %s1473_s30 = smov 4  }
 0x2a8   :  { %1032 = dma.vmem_to_hbm [thread:$0]  %s1027_s27, 2048, %s1813_s7, [#allocation3], %s1472_s29, %s1472_s29, %s1473_s30  }
 0x2a9   :  { %1469 = dma.done.wait [#allocation3], 2048  }
 0x2aa   :  { %1470 = vsyncadd [#allocation3], 4294965248 }
 0x2ab   :  { %1036 = vsyncpa [#allocation3], 1 }

</bundles_post_ra>
